<compile_context>
chip_gen: v7x
topology: tpu7x:2x2x1
jax: 0.10.0
libtpu: 0.0.40
codegen_flags: <defaults>
</compile_context>

<pallas_src>
import functools

import jax
import jax.numpy as jnp
from jax import lax
from jax.experimental import pallas as pl
from jax.experimental.pallas import tpu as pltpu


def _distance_loss_kernel(pred_ref, tgt_ref, out_ref, *, theta, TB, H, W, B):
    theta2 = jnp.float32(theta * theta)
    p = (theta - 1) // 2

    # Banded-ones matrices (|i-j| <= p) built in-kernel (bf16): encode the
    # zero-padded theta-wide box sum along each axis, never touch HBM/VMEM DMA.
    ir = lax.broadcasted_iota(jnp.int32, (W, W), 0)
    ic = lax.broadcasted_iota(jnp.int32, (W, W), 1)
    bw = (jnp.abs(ir - ic) <= p).astype(jnp.bfloat16)            # (W, W)
    jr = lax.broadcasted_iota(jnp.int32, (H, H), 0)
    jc = lax.broadcasted_iota(jnp.int32, (H, H), 1)
    bh = (jnp.abs(jr - jc) <= p).astype(jnp.bfloat16)            # (H, H)

    tgt = tgt_ref[...]                                           # (TB, H, W) native dtype
    pred = pred_ref[...]                                         # (TB, H, W) native dtype
    tgt_bf = tgt.astype(jnp.bfloat16)

    # Pass 1 (lane axis, W): one flat bf16 MXU matmul, f32 accumulation.
    s1 = jnp.dot(tgt_bf.reshape(TB * H, W), bw,
                 preferred_element_type=jnp.float32)             # (TB*H, W)

    # Pass 2 (sublane axis, H): batched bf16 MXU matmul. Box sums are small
    # integers (<= theta) -> exact in bf16 for 0/1 targets.
    s1_bf = s1.reshape(TB, H, W).astype(jnp.bfloat16)
    bh_b = jnp.broadcast_to(bh[None, :, :], (TB, H, H))
    s2 = jnp.einsum('bhk,bkw->bhw', bh_b, s1_bf,
                    preferred_element_type=jnp.float32)          # (TB, H, W)

    # Fused elementwise tail in f32.  gt_d = theta^2 - S.
    t = tgt.astype(jnp.float32)
    pr = pred.astype(jnp.float32)
    pt = pr * t
    u = pr - pt                          # predict * (1 - targets)
    fp = (theta2 - s2) * u               # gt_d * (1 - targets) * predict
    fn = t - pt                          # (1 - predict) * targets
    summand = fp + 4.0 * fn

    # Ragged-tail mask: rows whose global batch index >= B (undefined data in a
    # partial last block) contribute exactly 0 (mask the summand, not inputs).
    gb = pl.program_id(0) * TB + lax.broadcasted_iota(jnp.int32, (TB, 1, 1), 0)
    summand = jnp.where(gb < B, summand, 0.0)

    # Reduce batch + sublane axes here (XLU); cross-lane / cross-block reduce
    # and the division by B happen in the wrapper.
    # TODO(synk): for W far below 128 lanes, a lane-dense repack of the output
    # partials would avoid masked partial stores; negligible at these sizes.
    out_ref[...] = jnp.sum(summand, axis=(0, 1)).reshape(1, 1, W)


def distance_loss_pallas(predict, targets, theta=9):
    assert theta % 2 == 1, "theta must be odd (matches the PyTorch module default)"
    n, c, H, W = predict.shape
    B = n * c

    # Keep native dtypes end-to-end; reshape is a free view.
    pred = predict.reshape(B, H, W)
    tgt = targets.reshape(B, H, W)

    # ---- VMEM-budgeted batch tile (generation-aware) ---------------------
    try:
        vmem_cap = int(pltpu.get_tpu_info().vmem_capacity_bytes)
    except Exception:  # pragma: no cover - conservative fallback (v7x-safe)
        vmem_cap = 64 * 1024 * 1024
    vmem_limit = max(32 << 20, min(vmem_cap - (16 << 20), 100 << 20))

    in_per_img = H * W * (pred.dtype.itemsize + tgt.dtype.itemsize) * 2  # x2 double-buffer
    tmp_per_img = H * W * 28 + H * H * 2       # bf16 copies, s1/s2 f32, tail temps, bh broadcast
    band_bytes = 2 * (W * W + H * H)
    budget = max((vmem_limit // 2) - band_bytes, 1 << 20)
    TB = max(1, min(B, budget // max(in_per_img + tmp_per_img, 1), 512))

    # Keep >= 2 grid steps for non-trivial workloads so the "parallel" batch
    # axis can occupy both TensorCores on v7x.
    tot_in_bytes = B * H * W * (pred.dtype.itemsize + tgt.dtype.itemsize)
    if TB >= B and B >= 2 and tot_in_bytes >= (2 << 20):
        TB = -(-B // 2)

    nb = -(-B // TB)

    kernel = functools.partial(_distance_loss_kernel,
                               theta=theta, TB=TB, H=H, W=W, B=B)

    flops = int(2 * nb * TB * H * W * W + 2 * nb * TB * H * H * W + 10 * B * H * W)
    bytes_accessed = int(tot_in_bytes + 4 * nb * W)

    # TODO(synk): for very large H, W (>~512) a block-banded formulation of the
    # two band matmuls (only the 2-3 diagonal 128-blocks) would cut MXU FLOPs
    # and VMEM on v5e; dense bands are fine at the sizes exercised here.
    partials = pl.pallas_call(
        kernel,
        out_shape=jax.ShapeDtypeStruct((nb, 1, W), jnp.float32),
        grid=(nb,),
        in_specs=[
            pl.BlockSpec((TB, H, W), lambda i: (i, 0, 0)),
            pl.BlockSpec((TB, H, W), lambda i: (i, 0, 0)),
        ],
        out_specs=pl.BlockSpec((1, 1, W), lambda i: (i, 0, 0)),
        compiler_params=pltpu.CompilerParams(
            dimension_semantics=("parallel",),
            vmem_limit_bytes=int(vmem_limit),
        ),
        cost_estimate=pl.CostEstimate(
            flops=flops, transcendentals=0, bytes_accessed=bytes_accessed),
    )(pred, tgt)

    return jnp.sum(partials) / float(B)


def distance_loss_ref(predict, targets, theta=9):
    """Pure-JAX reference (mirrors the PyTorch forward) for correctness check."""
    n, c, H, W = predict.shape
    p = (theta - 1) // 2
    tgt = targets.astype(jnp.float32)
    prd = predict.astype(jnp.float32)
    t_p = jnp.pad(tgt, ((0, 0), (0, 0), (p, p), (p, p)), constant_values=0.0)
    gt_d = lax.reduce_window(
        1.0 - t_p, 0.0, lax.add,
        window_dimensions=(1, 1, theta, theta),
        window_strides=(1, 1, 1, 1),
        padding="VALID",
    )
    gt_d = gt_d * (1.0 - tgt)
    fn = (1.0 - prd) * tgt
    fp = gt_d * prd
    per = jnp.sum((fp + 4.0 * fn).reshape(n, c, -1), axis=2)
    return jnp.mean(per)


if __name__ == "__main__":
    key = jax.random.PRNGKey(0)
    k1, k2 = jax.random.split(key)
    # conv weight is [1, 1, theta, theta] => the module implies c == 1.
    n, c, H, W = 2, 1, 16, 16
    predict = jax.random.uniform(k1, (n, c, H, W), dtype=jnp.float32)
    targets = jax.random.bernoulli(k2, p=0.3, shape=(n, c, H, W)).astype(jnp.float32)

    loss = distance_loss_pallas(predict, targets, theta=9)
    jax.block_until_ready(loss)

    ref = distance_loss_ref(predict, targets, theta=9)
    assert jnp.allclose(loss, ref, rtol=1e-5, atol=1e-4), (loss, ref)
    print("KERNEL_OK")
</pallas_src>

<mosaic_0001>
module attributes {stable_mosaic.version = 11 : i64} {
  func.func @_distance_loss_kernel(%arg0: i32, %arg1: memref<2x16x16xf32, #tpu.memory_space<vmem>>, %arg2: memref<2x16x16xf32, #tpu.memory_space<vmem>>, %arg3: memref<1x1x16xf32, #tpu.memory_space<vmem>>) attributes {dimension_semantics = [#tpu.dimension_semantics<parallel>], iteration_bounds = array<i64: 1>, scalar_prefetch = 0 : i64, scratch_operands = 0 : i64, tpu.core_type = #tpu.core_type<tc>, window_params = [{transform_indices = @transform_0, window_bounds = array<i64: 2, 16, 16>}, {transform_indices = @transform_1, window_bounds = array<i64: 2, 16, 16>}, {transform_indices = @transform_2, window_bounds = array<i64: 1, 1, 16>}]} {
    %0 = tpu.iota {dimensions = array<i32: 0>} : vector<16x16xi32>
    %1 = tpu.iota {dimensions = array<i32: 1>} : vector<16x16xi32>
    %2 = arith.subi %0, %1 : vector<16x16xi32>
    %3 = math.absi %2 : vector<16x16xi32>
    %c4_i32 = arith.constant 4 : i32
    %4 = vector.broadcast %c4_i32 : i32 to vector<16x16xi32>
    %5 = arith.cmpi sle, %3, %4 : vector<16x16xi32>
    %6 = arith.extui %5 : vector<16x16xi1> to vector<16x16xi32>
    %7 = arith.sitofp %6 : vector<16x16xi32> to vector<16x16xf32>
    %8 = arith.truncf %7 : vector<16x16xf32> to vector<16x16xbf16>
    %9 = tpu.iota {dimensions = array<i32: 0>} : vector<16x16xi32>
    %10 = tpu.iota {dimensions = array<i32: 1>} : vector<16x16xi32>
    %11 = arith.subi %9, %10 : vector<16x16xi32>
    %12 = math.absi %11 : vector<16x16xi32>
    %c4_i32_0 = arith.constant 4 : i32
    %13 = vector.broadcast %c4_i32_0 : i32 to vector<16x16xi32>
    %14 = arith.cmpi sle, %12, %13 : vector<16x16xi32>
    %15 = arith.extui %14 : vector<16x16xi1> to vector<16x16xi32>
    %16 = arith.sitofp %15 : vector<16x16xi32> to vector<16x16xf32>
    %17 = arith.truncf %16 : vector<16x16xf32> to vector<16x16xbf16>
    %c0 = arith.constant 0 : index
    %c0_1 = arith.constant 0 : index
    %c0_2 = arith.constant 0 : index
    %18 = vector.load %arg2[%c0, %c0_1, %c0_2] : memref<2x16x16xf32, #tpu.memory_space<vmem>>, vector<2x16x16xf32>
    %c0_3 = arith.constant 0 : index
    %c0_4 = arith.constant 0 : index
    %c0_5 = arith.constant 0 : index
    %19 = vector.load %arg1[%c0_3, %c0_4, %c0_5] : memref<2x16x16xf32, #tpu.memory_space<vmem>>, vector<2x16x16xf32>
    %20 = arith.truncf %18 : vector<2x16x16xf32> to vector<2x16x16xbf16>
    %21 = vector.shape_cast %20 : vector<2x16x16xbf16> to vector<32x16xbf16>
    %cst = arith.constant dense<0.000000e+00> : vector<32x16xf32>
    %22 = tpu.matmul %21, %8, %cst {dimension_numbers = #tpu.dot_dimension_numbers<[1], [0], [0], [1], [0, 0, 1, 1], [], []>} : vector<32x16xbf16>, vector<16x16xbf16>, vector<32x16xf32> -> vector<32x16xf32>
    %23 = vector.shape_cast %22 : vector<32x16xf32> to vector<2x16x16xf32>
    %24 = arith.truncf %23 : vector<2x16x16xf32> to vector<2x16x16xbf16>
    %25 = vector.shape_cast %17 : vector<16x16xbf16> to vector<1x16x16xbf16>
    %26 = vector.shape_cast %25 : vector<1x16x16xbf16> to vector<1x16x16xbf16>
    %27 = vector.broadcast %26 : vector<1x16x16xbf16> to vector<2x16x16xbf16>
    "tpu.trace_start"() <{level = 10 : i32, message = "bhk,bkw->bhw"}> : () -> ()
    %cst_6 = arith.constant dense<0.000000e+00> : vector<2x16x16xf32>
    %28 = tpu.matmul %27, %24, %cst_6 {dimension_numbers = #tpu.dot_dimension_numbers<[2], [1], [1], [2], [0, 0, 0, 1, 1, 2], [0], [0]>} : vector<2x16x16xbf16>, vector<2x16x16xbf16>, vector<2x16x16xf32> -> vector<2x16x16xf32>
    "tpu.trace_stop"() : () -> ()
    %29 = arith.mulf %19, %18 : vector<2x16x16xf32>
    %30 = arith.subf %19, %29 : vector<2x16x16xf32>
    %cst_7 = arith.constant 8.100000e+01 : f32
    %31 = vector.broadcast %cst_7 : f32 to vector<2x16x16xf32>
    %32 = arith.subf %31, %28 : vector<2x16x16xf32>
    %33 = arith.mulf %32, %30 : vector<2x16x16xf32>
    %34 = arith.subf %18, %29 : vector<2x16x16xf32>
    %cst_8 = arith.constant 4.000000e+00 : f32
    %35 = vector.broadcast %cst_8 : f32 to vector<2x16x16xf32>
    %36 = arith.mulf %35, %34 : vector<2x16x16xf32>
    %37 = arith.addf %33, %36 : vector<2x16x16xf32>
    %c2_i32 = arith.constant 2 : i32
    %38 = arith.muli %arg0, %c2_i32 : i32
    %39 = tpu.iota {dimensions = array<i32: 0>} : vector<2x1x1xi32>
    %40 = vector.broadcast %38 : i32 to vector<2x1x1xi32>
    %41 = arith.addi %40, %39 : vector<2x1x1xi32>
    %c2_i32_9 = arith.constant 2 : i32
    %42 = vector.broadcast %c2_i32_9 : i32 to vector<2x1x1xi32>
    %43 = arith.cmpi slt, %41, %42 : vector<2x1x1xi32>
    %cst_10 = arith.constant 0.000000e+00 : f32
    %44 = vector.shape_cast %43 : vector<2x1x1xi1> to vector<2x1x1xi1>
    %45 = vector.broadcast %44 : vector<2x1x1xi1> to vector<2x16x16xi1>
    %46 = vector.broadcast %cst_10 : f32 to vector<2x16x16xf32>
    %47 = arith.select %45, %37, %46 : vector<2x16x16xi1>, vector<2x16x16xf32>
    %cst_11 = arith.constant dense<0.000000e+00> : vector<16xf32>
    %48 = vector.multi_reduction <add>, %47, %cst_11 [0, 1] : vector<2x16x16xf32> to vector<16xf32>
    %49 = vector.shape_cast %48 : vector<16xf32> to vector<1x1x16xf32>
    %c0_12 = arith.constant 0 : index
    %c0_13 = arith.constant 0 : index
    %c0_14 = arith.constant 0 : index
    %50 = vector.load %arg3[%c0_12, %c0_13, %c0_14] : memref<1x1x16xf32, #tpu.memory_space<vmem>>, vector<1x1x16xf32>
    tpu.vector_store %arg3[%c0_12, %c0_13, %c0_14], %49 {strides = array<i32>} : memref<1x1x16xf32, #tpu.memory_space<vmem>>, vector<1x1x16xf32>,
    return
  }
  func.func @transform_0(%arg0: i32) -> (i32, i32, i32) {
    %c0_i32 = arith.constant 0 : i32
    %c0_i32_0 = arith.constant 0 : i32
    %c0_i32_1 = arith.constant 0 : i32
    return %arg0, %c0_i32, %c0_i32_0 : i32, i32, i32
  }
  func.func @transform_1(%arg0: i32) -> (i32, i32, i32) {
    %c0_i32 = arith.constant 0 : i32
    %c0_i32_0 = arith.constant 0 : i32
    %c0_i32_1 = arith.constant 0 : i32
    return %arg0, %c0_i32, %c0_i32_0 : i32, i32, i32
  }
  func.func @transform_2(%arg0: i32) -> (i32, i32, i32) {
    %c0_i32 = arith.constant 0 : i32
    %c0_i32_0 = arith.constant 0 : i32
    %c0_i32_1 = arith.constant 0 : i32
    return %arg0, %c0_i32, %c0_i32_0 : i32, i32, i32
  }
}

</mosaic_0001>

<bundles_post_ra>
// kernel: tpu_custom_call.1
= control target key start
LH: loop header
LB: loop body
LE: loop exit
PB: predicated region body
PF: predicated region fallthrough
CT: control target
= control target key end

     0   :  { %7 = vsyncpa [#allocation3], 0  ;;  %s473_s0 = inlined_call_operand.hbm [shape: f32[2,16,16], index: 0, kind: input, shape index: {}]   ;;  %s474_s1 = inlined_call_operand.hbm [shape: f32[2,16,16], index: 1, kind: input, shape index: {}]   ;;  %s475_s2 = inlined_call_operand.hbm [shape: f32[1,1,16], index: 2, kind: output, shape index: {}]  }
   0x1   :  { %8 = vsyncpa [#allocation6], 0 }
   0x2   :  { %9 = vsyncpa [#allocation4], 0  ;;  %s401_s9 = smov [#allocation2]   ;;  %s329_s13 = scalar_lea.hbm %s473_s0, 512 }
   0x3   :  { %s15_s10 = sshll.u32 %s401_s9, 4  ;;  %p330_p0 = scmp.ne.s32.totalorder %s473_s0, %s329_s13  ;;  %s16_s10 = int_to_ptr.vmem [resolvable:$true] %s15_s10 }
   0x4   :  { %p333_p1 = scmp.lt.u32.totalorder %s329_s13, %s473_s0 }
   0x6   :  { %p335_p2 = pnand %p333_p1, %p330_p0 }
   0x8   :  { %338 = shalt.err (!%p335_p2)
}
   0x9   :  { %s339_s18 = scalar_lea.vmem %s16_s10, 512  ;;  %p344_p4 = scmp.lt.s32.totalorder %s16_s10, %s16_s10 }
   0xa   :  { %p340_p3 = scmp.ne.s32.totalorder %s16_s10, %s339_s18  ;;  %p345_p5 = scmp.lt.s32.totalorder %s339_s18, %s339_s18 }
   0xc   :  { %p346_p6 = por %p345_p5, %p344_p4 }
   0xe   :  { %p347_p7 = pnand %p346_p6, %p340_p3 }
  0x10   :  { %350 = shalt.err (!%p347_p7)
}
  0x11   :  { %s402_s19 = smov 128   ;;  %s403_s20 = smov 8  }
  0x12   :  { %21 = dma.hbm_to_vmem [thread:$0]  %s473_s0, 512, %s16_s10, [#allocation3], %s402_s19, %s402_s19, %s403_s20  }
  0x13   :  { %s404_s23 = smov [#allocation5]   ;;  %s351_s27 = scalar_lea.hbm %s474_s1, 512 }
  0x14   :  { %s27_s24 = sshll.u32 %s404_s23, 4  ;;  %p352_p8 = scmp.ne.s32.totalorder %s474_s1, %s351_s27  ;;  %s28_s24 = int_to_ptr.vmem [resolvable:$true] %s27_s24 }
  0x15   :  { %p355_p9 = scmp.lt.u32.totalorder %s351_s27, %s474_s1 }
  0x17   :  { %p357_p10 = pnand %p355_p9, %p352_p8 }
  0x19   :  { %360 = shalt.err (!%p357_p10)
}
  0x1a   :  { %s361_s4 = scalar_lea.vmem %s28_s24, 512  ;;  %p366_p12 = scmp.lt.s32.totalorder %s28_s24, %s28_s24 }
  0x1b   :  { %p362_p11 = scmp.ne.s32.totalorder %s28_s24, %s361_s4  ;;  %p367_p13 = scmp.lt.s32.totalorder %s361_s4, %s361_s4 }
  0x1d   :  { %p368_p0 = por %p367_p13, %p366_p12 }
  0x1f   :  { %p369_p1 = pnand %p368_p0, %p362_p11 }
  0x21   :  { %372 = shalt.err (!%p369_p1)
}
  0x22   :  { %33 = dma.hbm_to_vmem [thread:$0]  %s474_s1, 512, %s28_s24, [#allocation6], %s402_s19, %s402_s19, %s403_s20  }
  0x23   :  { %395 = dma.done.wait [#allocation3], 512  }
  0x24   :  { %396 = vsyncadd [#allocation3], 4294966784 }
  0x25   :  { %397 = dma.done.wait [#allocation6], 512  }
  0x26   :  { %398 = vsyncadd [#allocation6], 4294966784  ;;  %v41_v0 = vlaneseq  ;;  %v405_v1 = vmov 0.0   ;;  %v61_v8 = vld [vmem:[#allocation5] sm:$0xff]  ;;  %v448_v9 = vld [vmem:[#allocation5 + $0x8] sm:$0xff]  ;;  %vm71_vm0 = vcmask 130048  }
  0x27   :  { %309 = vmatprep.subr.bf16.mxu1 %v405_v1  ;;  %v69_v12 = vpack.c.bf16 %v448_v9, %v61_v8  ;;  %v63_v15 = vld [vmem:[#allocation5 + $0x10] sm:$0xff]  ;;  %v64_v16 = vld [vmem:[#allocation5 + $0x18] sm:$0xff]  ;;  %v406_v19 = vmov 1.0|1.0   ;;  %vm407_vm4 = vmmov 0   ;;  %v65_v27 = vld [vmem:[#allocation2] sm:$0xff] }
  0x28   :  { %v42_v2 = vshrl.u32 %v41_v0, 7  ;;  %v45_v3 = vand.u32 127, %v41_v0  ;;  %v70_v20 = vpack.c.bf16 %v64_v16, %v63_v15  ;;  %311 = vmatprep.mubr.msk.bf16.mxu1 %vm407_vm4, %v405_v1  ;;  %v67_v28 = vld [vmem:[#allocation2 + $0x10] sm:$0xff]  ;;  %v214_v29 = vmul.f32 %v65_v27, %v61_v8  ;;  %v66_v30 = vld [vmem:[#allocation2 + $0x8] sm:$0xff]  ;;  %v68_v32 = vld [vmem:[#allocation2 + $0x18] sm:$0xff]  ;;  %s408_s1 = smov [#allocation7]  }
  0x29   :  { %305 = vmatprep.mubr.msk.bf16.mxu0 %vm71_vm0, %v69_v12  ;;  %v216_v31 = vmul.f32 %v67_v28, %v63_v15  ;;  %v215_v33 = vmul.f32 %v66_v30, %v448_v9  ;;  %v217_v35 = vmul.f32 %v68_v32, %v64_v16  ;;  %s276_s6 = sshll.u32 %s408_s1, 4  ;;  %vm268_vm5 = vcmask 122880   ;;  %s277_s6 = int_to_ptr.vmem [resolvable:$true] %s276_s6 }
  0x2a   :  { %v43_v4 = vadd.s32 8, %v42_v2  ;;  %v46_v5 = vsub.s32 %v42_v2, %v45_v3  ;;  %v230_v34 = vsub.f32 %v61_v8, %v214_v29  ;;  %v218_v38 = vsub.f32 %v65_v27, %v214_v29  ;;  %s373_s7 = scalar_lea.vmem %s277_s6, 16  ;;  %s377_s8 = scalar_lea.vmem %s277_s6, 32 }
  0x2b   :  { %v232_v36 = vsub.f32 %v63_v15, %v216_v31  ;;  %v220_v37 = vsub.f32 %v67_v28, %v216_v31  ;;  %v231_v40 = vsub.f32 %v448_v9, %v215_v33  ;;  %v233_v45 = vsub.f32 %v64_v16, %v217_v35  ;;  %p374_p2 = scmp.ne.s32.totalorder %s277_s6, %s373_s7  ;;  %p378_p3 = scmp.lt.s32.totalorder %s277_s6, %s277_s6 }
  0x2c   :  { %v47_v6 = vsub.s32 %v43_v4, %v45_v3  ;;  %v49_v7 = vsub.s32 0, %v46_v5  ;;  %v234_v42 = vmul.f32 4.0, %v230_v34  ;;  %v219_v49 = vsub.f32 %v66_v30, %v215_v33  ;;  %p379_p4 = scmp.lt.s32.totalorder %s377_s8, %s373_s7 }
  0x2d   :  { %v236_v48 = vmul.f32 4.0, %v232_v36  ;;  %v221_v51 = vsub.f32 %v68_v32, %v217_v35  ;;  %v235_v58 = vmul.f32 4.0, %v231_v40  ;;  %v237_v60 = vmul.f32 4.0, %v233_v45 }
  0x2e   :  { %v286_v10 = vmin.u32 %v49_v7, %v46_v5  ;;  %v52_v11 = vsub.s32 0, %v47_v6  ;;  %p380_p5 = por %p379_p4, %p378_p3 }
  0x30   :  { %v287_v13 = vmin.u32 %v52_v11, %v47_v6  ;;  %vm54_vm1 = vcmp.le.s32.totalorder %v286_v10, 4  ;;  %p381_p6 = pnand %p380_p5, %p374_p2 }
  0x31   :  { %v288_v14 = vsel %vm54_vm1, 1.0, %v405_v1 }
  0x32   :  { %vm55_vm2 = vcmp.le.s32.totalorder %v287_v13, 4 }
  0x33   :  { %v289_v17 = vsel %vm55_vm2, 1.0, %v405_v1  ;;  %vm290_vm3 = vmpackc.low %vm55_vm2, %vm54_vm1 }
  0x34   :  { %v60_v18 = vpack.c.bf16 %v289_v17, %v288_v14  ;;  %303 = vmatprep.subr.msk.bf16.mxu0 %vm290_vm3, %v406_v19 }
  0x35   :  { %304 = vmatpush3.bf16.msk.msra.mxu0 %vm290_vm3, %v406_v19 }
  0x36   :  { %315 = vmatprep.subr.bf16.mxu0 %v405_v1 }
  0x38   :  { %306 = vmatmul.mubr.msk.bf16.vlgmr.msra.gmra.mrb[0].mxu0 %vm71_vm0, %v70_v20 }
  0x39   :  { %317 = vmatprep.mubr.msk.bf16.mxu0 %vm407_vm4, %v405_v1 }
 0x10b   :  { %v307_v21 = vpop.f32.mrb[0].mxu0 }
 0x10c   :  { %v112_v22 = vpop.f32.mrb[1].mxu0 }
 0x10d   :  { %v308_v23 = vpop.f32.mrb[2].mxu0 }
 0x10e   :  { %v128_v24 = vpack.c.bf16 %v308_v23, %v307_v21  ;;  %v115_v25 = vpop.f32.mrb[3].mxu0 }
 0x10f   :  { %v127_v26 = vpack.c.bf16 %v115_v25, %v112_v22 }
 0x110   :  { %316 = vmatpush3.bf16.msra.mxu0 %v128_v24 }
 0x111   :  { %310 = vmatpush3.bf16.msra.mxu1 %v127_v26 }
 0x113   :  { %318 = vmatmul.mubr.msk.bf16.vlgmr.msra.gmra.mrb[4].mxu0 %vm71_vm0, %v60_v18 }
 0x114   :  { %312 = vmatmul.mubr.msk.bf16.vlgmr.msra.gmra.mrb[0].mxu1 %vm71_vm0, %v60_v18 }
 0x1e6   :  { %v207_v39 = vpop.f32.mrb[4].mxu0 }
 0x1e7   :  { %v166_v41 = vpop.f32.mrb[0].mxu1  ;;  %v224_v43 = vsub.f32 81.0, %v207_v39  ;;  %v319_v44 = vpop.f32.mrb[5].mxu0 }
 0x1e8   :  { %v222_v46 = vsub.f32 81.0, %v166_v41  ;;  %v313_v47 = vpop.f32.mrb[1].mxu1  ;;  %v210_v50 = vpop.f32.mrb[6].mxu0 }
 0x1e9   :  { %v228_v52 = vmul.f32 %v224_v43, %v220_v37  ;;  %v169_v53 = vpop.f32.mrb[2].mxu1  ;;  %v225_v54 = vsub.f32 81.0, %v210_v50  ;;  %v320_v55 = vpop.f32.mrb[7].mxu0 }
 0x1ea   :  { %v226_v56 = vmul.f32 %v222_v46, %v218_v38  ;;  %v223_v57 = vsub.f32 81.0, %v169_v53  ;;  %v314_v59 = vpop.f32.mrb[3].mxu1 }
 0x1eb   :  { %v240_v62 = vadd.f32 %v236_v48, %v228_v52  ;;  %v229_v0 = vmul.f32 %v225_v54, %v221_v51 }
 0x1ec   :  { %v238_v61 = vadd.f32 %v234_v42, %v226_v56  ;;  %v227_v63 = vmul.f32 %v223_v57, %v219_v49 }
 0x1ed   :  { %v258_v3 = vsel %vm71_vm0, %v240_v62, 0.0  ;;  %v241_v5 = vadd.f32 %v237_v60, %v229_v0 }
 0x1ee   :  { %v239_v1 = vadd.f32 %v235_v58, %v227_v63  ;;  %v255_v2 = vsel %vm71_vm0, %v238_v61, 0.0 }
 0x1ef   :  { %v260_v8 = vsel %vm71_vm0, %v241_v5, 0.0 }
 0x1f0   :  { %v256_v4 = vsel %vm71_vm0, %v239_v1, 0.0 }
 0x1f1   :  { %v257_v6 = vadd.f32 %v256_v4, %v255_v2 }
 0x1f3   :  { %v259_v7 = vadd.f32 %v258_v3, %v257_v6 }
 0x1f5   :  { %v261_v9 = vadd.f32 %v260_v8, %v259_v7 }
 0x1f7   :  { %v262_v10 = vrot.slane %v261_v9, 4 }
 0x1f9   :  { %v263_v11 = vadd.f32 %v262_v10, %v261_v9 }
 0x1fb   :  { %v264_v12 = vrot.slane %v263_v11, 2 }
 0x1fd   :  { %v265_v13 = vadd.f32 %v264_v12, %v263_v11 }
 0x1ff   :  { %v266_v14 = vrot.slane %v265_v13, 1 }
 0x201   :  { %v267_v15 = vadd.f32 %v266_v14, %v265_v13 }
 0x203   :  { %269 = vst.msk [vmem:[#allocation7] sm:$0x1] %vm268_vm5, %v267_v15 }
 0x204   :  { %384 = shalt.err (!%p381_p6)
}
 0x205   :  { %s385_s11 = scalar_lea.hbm %s475_s2, 16 }
 0x206   :  { %p386_p7 = scmp.ne.s32.totalorder %s475_s2, %s385_s11  ;;  %p389_p8 = scmp.lt.u32.totalorder %s385_s11, %s475_s2 }
 0x208   :  { %p391_p9 = pnand %p389_p8, %p386_p7 }
 0x20a   :  { %394 = shalt.err (!%p391_p9)
}
 0x20b   :  { %279 = dma.vmem_to_hbm [thread:$0]  %s277_s6, 16, %s475_s2, [#allocation4]  }
 0x20c   :  { %399 = dma.done.wait [#allocation4], 16  }
 0x20d   :  { %400 = vsyncadd [#allocation4], 4294967280 }
 0x20e   :  { %283 = vsyncpa [#allocation3], 1 }
 0x20f   :  { %284 = vsyncpa [#allocation6], 1 }
 0x210   :  { %285 = vsyncpa [#allocation4], 1 }

</bundles_post_ra>
